<compile_context>
chip_gen: v7x
topology: tpu7x:2x2x1
jax: 0.10.0
libtpu: 0.0.40
codegen_flags: <defaults>
</compile_context>

<pallas_src>
import jax
import jax.numpy as jnp
from jax.experimental import pallas as pl
from jax.experimental.pallas import tpu as pltpu


def iterative_graph_kernel(x_ref, w1_ref, b1_ref, w2_ref, b2_ref, o_ref):
    # Layer 1: Linear (bf16 MXU operands, f32 accumulate) + bias + ReLU in f32.
    x = x_ref[...]                                     # (TILE_N, C_IN) bf16
    h = jnp.dot(x, w1_ref[...], preferred_element_type=jnp.float32)
    h = jnp.maximum(h + b1_ref[...], 0.0)              # f32 elementwise

    # TODO(synk): dropout is identity here (inference mode); training-mode dropout
    # would use pltpu.prng_seed + pltpu.stateful_bernoulli with 1/(1-p) rescale.

    # Layer 2: Linear (cast activations to bf16 for the MXU, f32 accumulate).
    logits = jnp.dot(h.astype(w2_ref.dtype), w2_ref[...],
                     preferred_element_type=jnp.float32) + b2_ref[...]

    # log_softmax over the last axis (numerically stable, f32).
    m = jnp.max(logits, axis=-1, keepdims=True)
    z = logits - m
    lse = jnp.log(jnp.sum(jnp.exp(z), axis=-1, keepdims=True))
    o_ref[...] = (z - lse).astype(o_ref.dtype)


def _round_up(a, b):
    return ((a + b - 1) // b) * b


def iterative_graph_forward(x, w1, b1, w2, b2, *, tile_n=1024):
    """x: (N, C_in); w1: (C_in, C_hid); b1: (1, C_hid); w2: (C_hid, C_out); b2: (1, C_out)."""
    n, c_in = x.shape
    c_hid = w1.shape[1]
    c_out = w2.shape[1]

    # Row tile: large to amortize per-grid-step overhead; multiple of 16 so bf16
    # sublane packing and the (8,128) block rule are both satisfied.
    tile_n = max(16, min(tile_n, _round_up(n, 16)))
    n_pad = _round_up(n, tile_n)

    # bf16 operands for the MXU; biases stay f32 for f32 elementwise math.
    x_bf = x.astype(jnp.bfloat16)
    if n_pad != n:
        x_bf = jnp.pad(x_bf, ((0, n_pad - n), (0, 0)))
    w1_bf = w1.astype(jnp.bfloat16)
    w2_bf = w2.astype(jnp.bfloat16)
    b1_f = b1.astype(jnp.float32)
    b2_f = b2.astype(jnp.float32)

    grid = (n_pad // tile_n,)

    out = pl.pallas_call(
        iterative_graph_kernel,
        out_shape=jax.ShapeDtypeStruct((n_pad, c_out), jnp.float32),
        grid=grid,
        in_specs=[
            # x: tiled over rows, pipelined (double-buffered) across grid steps.
            pl.BlockSpec((tile_n, c_in), lambda i: (i, 0)),
            # Weights / biases: constant index_map -> VMEM-resident across steps.
            pl.BlockSpec((c_in, c_hid), lambda i: (0, 0)),
            pl.BlockSpec((1, c_hid), lambda i: (0, 0)),
            pl.BlockSpec((c_hid, c_out), lambda i: (0, 0)),
            pl.BlockSpec((1, c_out), lambda i: (0, 0)),
        ],
        out_specs=pl.BlockSpec((tile_n, c_out), lambda i: (i, 0)),
        compiler_params=pltpu.CompilerParams(
            # Independent row tiles -> shard across v7x's two TensorCores.
            dimension_semantics=("parallel",),
        ),
    )(x_bf, w1_bf, b1_f, w2_bf, b2_f)

    return out[:n]


def reference_forward_f32(x, w1, b1, w2, b2):
    h = jnp.maximum(x @ w1 + b1, 0.0)
    logits = h @ w2 + b2
    return jax.nn.log_softmax(logits, axis=-1)


def reference_forward_bf16(x, w1, b1, w2, b2):
    # Same bf16-operand / f32-accumulate math as the kernel, for tight comparison.
    h = jnp.dot(x.astype(jnp.bfloat16), w1.astype(jnp.bfloat16),
                preferred_element_type=jnp.float32)
    h = jnp.maximum(h + b1, 0.0)
    logits = jnp.dot(h.astype(jnp.bfloat16), w2.astype(jnp.bfloat16),
                     preferred_element_type=jnp.float32) + b2
    return jax.nn.log_softmax(logits, axis=-1)


if __name__ == "__main__":
    # Small shapes consistent with the module: N rows of node features.
    # tile_n=128 with N=256 exercises a 2-step grid (resident weights, pipelined x).
    N, C_IN, C_HID, C_OUT = 256, 32, 64, 16
    TILE_N = 128

    key = jax.random.PRNGKey(0)
    kx, kw1, kb1, kw2, kb2 = jax.random.split(key, 5)

    x = jax.random.normal(kx, (N, C_IN), dtype=jnp.float32)

    # Deterministic parameter init (PyTorch-style uniform bound 1/sqrt(fan_in)),
    # stored pre-transposed for row-major matmul.
    bound1 = 1.0 / jnp.sqrt(jnp.float32(C_IN))
    bound2 = 1.0 / jnp.sqrt(jnp.float32(C_HID))
    w1 = jax.random.uniform(kw1, (C_IN, C_HID), jnp.float32, -bound1, bound1)
    b1 = jax.random.uniform(kb1, (1, C_HID), jnp.float32, -bound1, bound1)
    w2 = jax.random.uniform(kw2, (C_HID, C_OUT), jnp.float32, -bound2, bound2)
    b2 = jax.random.uniform(kb2, (1, C_OUT), jnp.float32, -bound2, bound2)

    out = iterative_graph_forward(x, w1, b1, w2, b2, tile_n=TILE_N)
    out = jax.block_until_ready(out)
    assert out.shape == (N, C_OUT)

    # Tight check against the identical bf16-operand / f32-accumulate math.
    ref_bf16 = reference_forward_bf16(x, w1, b1, w2, b2)
    assert jnp.allclose(out, ref_bf16, atol=1e-4, rtol=1e-4), "mismatch vs bf16 reference"

    # Loose check against full-f32 math (bf16 operand rounding only).
    ref_f32 = reference_forward_f32(x, w1, b1, w2, b2)
    assert jnp.allclose(out, ref_f32, atol=3e-2, rtol=3e-2), "mismatch vs f32 reference"

    print("KERNEL_OK")
</pallas_src>

<mosaic_0001>
module attributes {stable_mosaic.version = 11 : i64} {
  func.func @iterative_graph_kernel(%arg0: i32, %arg1: memref<128x32xbf16, #tpu.memory_space<vmem>>, %arg2: memref<32x64xbf16, #tpu.memory_space<vmem>>, %arg3: memref<1x64xf32, #tpu.memory_space<vmem>>, %arg4: memref<64x16xbf16, #tpu.memory_space<vmem>>, %arg5: memref<1x16xf32, #tpu.memory_space<vmem>>, %arg6: memref<128x16xf32, #tpu.memory_space<vmem>>) attributes {dimension_semantics = [#tpu.dimension_semantics<parallel>], iteration_bounds = array<i64: 2>, scalar_prefetch = 0 : i64, scratch_operands = 0 : i64, tpu.core_type = #tpu.core_type<tc>, window_params = [{transform_indices = @transform_0, window_bounds = array<i64: 128, 32>}, {pipeline_mode = #tpu.pipeline_mode<synchronous>, transform_indices = @transform_1, window_bounds = array<i64: 32, 64>}, {pipeline_mode = #tpu.pipeline_mode<synchronous>, transform_indices = @transform_2, window_bounds = array<i64: 1, 64>}, {pipeline_mode = #tpu.pipeline_mode<synchronous>, transform_indices = @transform_3, window_bounds = array<i64: 64, 16>}, {pipeline_mode = #tpu.pipeline_mode<synchronous>, transform_indices = @transform_4, window_bounds = array<i64: 1, 16>}, {transform_indices = @transform_5, window_bounds = array<i64: 128, 16>}]} {
    %c0 = arith.constant 0 : index
    %c0_0 = arith.constant 0 : index
    %0 = vector.load %arg1[%c0, %c0_0] : memref<128x32xbf16, #tpu.memory_space<vmem>>, vector<128x32xbf16>
    %c0_1 = arith.constant 0 : index
    %c0_2 = arith.constant 0 : index
    %1 = vector.load %arg2[%c0_1, %c0_2] : memref<32x64xbf16, #tpu.memory_space<vmem>>, vector<32x64xbf16>
    %cst = arith.constant dense<0.000000e+00> : vector<128x64xf32>
    %2 = tpu.matmul %0, %1, %cst {dimension_numbers = #tpu.dot_dimension_numbers<[1], [0], [0], [1], [0, 0, 1, 1], [], []>} : vector<128x32xbf16>, vector<32x64xbf16>, vector<128x64xf32> -> vector<128x64xf32>
    %c0_3 = arith.constant 0 : index
    %c0_4 = arith.constant 0 : index
    %3 = vector.load %arg3[%c0_3, %c0_4] : memref<1x64xf32, #tpu.memory_space<vmem>>, vector<1x64xf32>
    %4 = vector.broadcast %3 : vector<1x64xf32> to vector<128x64xf32>
    %5 = arith.addf %2, %4 : vector<128x64xf32>
    %cst_5 = arith.constant 0.000000e+00 : f32
    %6 = vector.broadcast %cst_5 : f32 to vector<128x64xf32>
    %7 = arith.maximumf %5, %6 : vector<128x64xf32>
    %8 = arith.truncf %7 : vector<128x64xf32> to vector<128x64xbf16>
    %c0_6 = arith.constant 0 : index
    %c0_7 = arith.constant 0 : index
    %9 = vector.load %arg4[%c0_6, %c0_7] : memref<64x16xbf16, #tpu.memory_space<vmem>>, vector<64x16xbf16>
    %cst_8 = arith.constant dense<0.000000e+00> : vector<128x16xf32>
    %10 = tpu.matmul %8, %9, %cst_8 {dimension_numbers = #tpu.dot_dimension_numbers<[1], [0], [0], [1], [0, 0, 1, 1], [], []>} : vector<128x64xbf16>, vector<64x16xbf16>, vector<128x16xf32> -> vector<128x16xf32>
    %c0_9 = arith.constant 0 : index
    %c0_10 = arith.constant 0 : index
    %11 = vector.load %arg5[%c0_9, %c0_10] : memref<1x16xf32, #tpu.memory_space<vmem>>, vector<1x16xf32>
    %12 = vector.broadcast %11 : vector<1x16xf32> to vector<128x16xf32>
    %13 = arith.addf %10, %12 : vector<128x16xf32>
    %cst_11 = arith.constant dense<0xFF800000> : vector<128xf32>
    %14 = vector.multi_reduction <maximumf>, %13, %cst_11 [1] : vector<128x16xf32> to vector<128xf32>
    %15 = vector.shape_cast %14 : vector<128xf32> to vector<128x1xf32>
    %16 = vector.broadcast %15 : vector<128x1xf32> to vector<128x16xf32>
    %17 = arith.subf %13, %16 : vector<128x16xf32>
    %18 = math.exp %17 : vector<128x16xf32>
    %cst_12 = arith.constant dense<0.000000e+00> : vector<128xf32>
    %19 = vector.multi_reduction <add>, %18, %cst_12 [1] : vector<128x16xf32> to vector<128xf32>
    %20 = vector.shape_cast %19 : vector<128xf32> to vector<128x1xf32>
    %21 = math.log %20 : vector<128x1xf32>
    %22 = vector.broadcast %21 : vector<128x1xf32> to vector<128x16xf32>
    %23 = arith.subf %17, %22 : vector<128x16xf32>
    %c0_13 = arith.constant 0 : index
    %c0_14 = arith.constant 0 : index
    %24 = vector.load %arg6[%c0_13, %c0_14] : memref<128x16xf32, #tpu.memory_space<vmem>>, vector<128x16xf32>
    tpu.vector_store %arg6[%c0_13, %c0_14], %23 {strides = array<i32>} : memref<128x16xf32, #tpu.memory_space<vmem>>, vector<128x16xf32>,
    return
  }
  func.func @transform_0(%arg0: i32) -> (i32, i32) {
    %c0_i32 = arith.constant 0 : i32
    %c0_i32_0 = arith.constant 0 : i32
    return %arg0, %c0_i32 : i32, i32
  }
  func.func @transform_1(%arg0: i32) -> (i32, i32) {
    %c0_i32 = arith.constant 0 : i32
    %c0_i32_0 = arith.constant 0 : i32
    %c0_i32_1 = arith.constant 0 : i32
    return %c0_i32, %c0_i32_0 : i32, i32
  }
  func.func @transform_2(%arg0: i32) -> (i32, i32) {
    %c0_i32 = arith.constant 0 : i32
    %c0_i32_0 = arith.constant 0 : i32
    %c0_i32_1 = arith.constant 0 : i32
    return %c0_i32, %c0_i32_0 : i32, i32
  }
  func.func @transform_3(%arg0: i32) -> (i32, i32) {
    %c0_i32 = arith.constant 0 : i32
    %c0_i32_0 = arith.constant 0 : i32
    %c0_i32_1 = arith.constant 0 : i32
    return %c0_i32, %c0_i32_0 : i32, i32
  }
  func.func @transform_4(%arg0: i32) -> (i32, i32) {
    %c0_i32 = arith.constant 0 : i32
    %c0_i32_0 = arith.constant 0 : i32
    %c0_i32_1 = arith.constant 0 : i32
    return %c0_i32, %c0_i32_0 : i32, i32
  }
  func.func @transform_5(%arg0: i32) -> (i32, i32) {
    %c0_i32 = arith.constant 0 : i32
    %c0_i32_0 = arith.constant 0 : i32
    return %arg0, %c0_i32 : i32, i32
  }
}

</mosaic_0001>

<bundles_post_ra>
// kernel: tpu_custom_call.1
= control target key start
LH: loop header
LB: loop body
LE: loop exit
PB: predicated region body
PF: predicated region fallthrough
CT: control target
= control target key end

     0   :  { %s1113_s18 = smov 0   ;;  %s1368_s0 = inlined_call_operand.vmem [shape: bf16[256,32], index: 0, kind: input, shape index: {}]   ;;  %s1369_s1 = inlined_call_operand.vmem [shape: bf16[32,64], index: 1, kind: input, shape index: {}]   ;;  %s1370_s2 = inlined_call_operand.vmem [shape: f32[1,64], index: 2, kind: input, shape index: {}]   ;;  %s1371_s3 = inlined_call_operand.vmem [shape: bf16[64,16], index: 3, kind: input, shape index: {}]   ;;  %s1372_s4 = inlined_call_operand.vmem [shape: f32[1,16], index: 4, kind: input, shape index: {}]   ;;  %s1373_s5 = inlined_call_operand.vmem [shape: f32[256,16], index: 5, kind: output, shape index: {}]  }
   0x1 LB: > { %s880_s19 = sadd.s32 4294967295, %s1081_s18   ;;  %p884_p0 = scmp.ge.s32.totalorder %s1081_s18, 1  ;;  %s1081_s18 = sphi %s1113_s18, %s15_s18  }
   0x2   : > { %p188_p1 = scmp.lt.s32.totalorder %s1081_s18, 3 }
   0x4   : > { %p189_p2 = pnand %p884_p0, %p188_p1 }
   0x5   : > { %v997_v0 = vld [vmem:[%s1369_s1] sm:$0xff] (!%p189_p2)   ;;  %s885_s22 = sshll.u32 (!%p189_p2), %s880_s19, 4  ;;  %v998_v1 = vld [vmem:[%s1369_s1 + $0x8] sm:$0xff] (!%p189_p2)   ;;  %vm308_vm0 = vcmask (!%p189_p2), 261120   ;;  %v1009_v12 = vld [vmem:[%s1371_s3 + $0x10] sm:$0xff] (!%p189_p2)   ;;  %vm493_vm1 = vcmask (!%p189_p2), 523264  }
   0x6   : > { %192 = sbr.rel (%p189_p2) target bundleno = 803 (0x323), region = 40  ;;  %p217_p3 = scmp.lt.s32.totalorder (!%p189_p2), %s885_s22, 31  ;;  %945 = vmatprep.subr.bf16.mxu0 (!%p189_p2), %v997_v0  ;;  %v1007_v2 = vld [vmem:[%s1371_s3] sm:$0xff] (!%p189_p2)   ;;  %v1008_v3 = vld [vmem:[%s1371_s3 + $0x8] sm:$0xff] (!%p189_p2)   ;;  %v1010_v13 = vld [vmem:[%s1371_s3 + $0x18] sm:$0xff] (!%p189_p2)   ;;  %vm615_vm2 = vcmask (!%p189_p2), 130048  }
   0x7   : > { %946 = vmatpush3.bf16.msra.mxu0 (!%p189_p2), %v997_v0  ;;  %965 = vmatprep.subr.bf16.mxu1 (!%p189_p2), %v1007_v2  ;;  %v889_v14 = vld [vmem:[%s1370_s2] ss:$0 sm:$0xff] (!%p189_p2) }
   0x8   : > { %947 = vmatprep.subr.bf16.mxu0 (!%p189_p2), %v998_v1  ;;  %966 = vmatpush3.bf16.msra.mxu1 (!%p189_p2), %v1007_v2 }
   0x9   : > { %967 = vmatprep.subr.bf16.mxu1 (!%p189_p2), %v1008_v3 }
   0xb   : > { %948 = vmatpush3.bf16.msra.mxu0 (!%p189_p2), %v998_v1 }
   0xc   : > { %968 = vmatpush3.bf16.msra.mxu1 (!%p189_p2), %v1008_v3 }
   0xd   : > { %s1375_s22 = smov (!%p217_p3, %s885_s22), 31  ;;  %969 = vmatprep.subr.bf16.mxu1 %v1009_v12 }
   0xe   : > { %s886_s29 = sshll.u32 %s1375_s22, 2  ;;  %s888_s16 = sshll.u32 %s1375_s22, 3 }
   0xf   : > { %s220_s7 = scalar_lea.vmem %s1368_s0, %s886_s29  ;;  %s1315_s20 = scalar_lea.vmem %s1373_s5, %s888_s16 }
  0x10   : > { %v999_v4 = vld [vmem:[%s220_s7] sm:$0xff]   ;;  %v1000_v5 = vld [vmem:[%s220_s7 + $0x8] sm:$0xff]   ;;  %v1001_v6 = vld [vmem:[%s220_s7 + $0x10] sm:$0xff]   ;;  %970 = vmatpush3.bf16.msra.mxu1 %v1009_v12 }
  0x11   : > { %949 = vmatprep.mubr.msk.bf16.mxu0 %vm308_vm0, %v999_v4  ;;  %v1002_v7 = vld [vmem:[%s220_s7 + $0x18] sm:$0xff]   ;;  %v1003_v8 = vld [vmem:[%s220_s7 + $0x20] sm:$0xff]   ;;  %v1004_v9 = vld [vmem:[%s220_s7 + $0x28] sm:$0xff]   ;;  %971 = vmatprep.subr.bf16.mxu1 %v1010_v13 }
  0x12   : > { %950 = vmatmul.mubr.msk.bf16.vlgmr.msra.gmra.mrb[0].mxu0 %vm308_vm0, %v1000_v5  ;;  %v1005_v10 = vld [vmem:[%s220_s7 + $0x30] sm:$0xff]   ;;  %v1006_v11 = vld [vmem:[%s220_s7 + $0x38] sm:$0xff]  }
  0x13   : > { %953 = vmatprep.mubr.msk.bf16.mxu0 %vm308_vm0, %v1001_v6 }
  0x14   : > { %972 = vmatpush3.bf16.msra.mxu1 %v1010_v13 }
  0x1a   : > { %954 = vmatmul.mubr.msk.bf16.gmra.mrb[4].mxu0 %vm308_vm0, %v1002_v7  ;;  %v908_v7 = vld [vmem:[%s1372_s4] ss:$0 sm:$0xff] }
  0x1b   : > { %957 = vmatprep.mubr.msk.bf16.mxu0 %vm308_vm0, %v1003_v8 }
  0x22   : > { %958 = vmatmul.mubr.msk.bf16.gmra.mrb[8].mxu0 %vm308_vm0, %v1004_v9 }
  0x23   : > { %961 = vmatprep.mubr.msk.bf16.mxu0 %vm308_vm0, %v1005_v10 }
  0x2a   : > { %962 = vmatmul.mubr.msk.bf16.gmra.mrb[12].mxu0 %vm308_vm0, %v1006_v11 }
  0xe5   : > { %v951_v15 = vpop.f32.mrb[0].mxu0 }
  0xe6   : > { %v376_v16 = vadd.f32 %v951_v15, %v889_v14  ;;  %v367_v17 = vpop.f32.mrb[1].mxu0 }
  0xe7   : > { %v368_v18 = vadd.f32 %v889_v14, %v367_v17  ;;  %v952_v19 = vpop.f32.mrb[2].mxu0 }
  0xe8   : > { %v379_v20 = vadd.f32 %v952_v19, %v889_v14  ;;  %v370_v21 = vpop.f32.mrb[3].mxu0  ;;  %v432_v23 = vmax.f32 %v376_v16, 0.0 }
  0xe9   : > { %v371_v22 = vadd.f32 %v889_v14, %v370_v21  ;;  %v430_v25 = vmax.f32 %v368_v18, 0.0 }
  0xea   : > { %v433_v24 = vmax.f32 %v379_v20, 0.0 }
  0xeb   : > { %v431_v26 = vmax.f32 %v371_v22, 0.0 }
  0xec   : > { %v447_v27 = vpack.c.bf16 %v433_v24, %v432_v23 }
  0xed   : > { %v955_v28 = vpop.f32.mrb[4].mxu0  ;;  %v446_v29 = vpack.c.bf16 %v431_v26, %v430_v25 }
  0xee   : > { %v392_v30 = vadd.f32 %v955_v28, %v889_v14  ;;  %v383_v31 = vpop.f32.mrb[5].mxu0 }
  0xef   : > { %v384_v32 = vadd.f32 %v889_v14, %v383_v31  ;;  %v956_v33 = vpop.f32.mrb[6].mxu0  ;;  %973 = vmatprep.mubr.msk.bf16.mxu1 %vm493_vm1, %v446_v29 }
  0xf0   : > { %v436_v34 = vmax.f32 %v392_v30, 0.0  ;;  %v395_v35 = vadd.f32 %v956_v33, %v889_v14  ;;  %v386_v36 = vpop.f32.mrb[7].mxu0  ;;  %974 = vmatmul.mubr.msk.bf16.vlgmr.msra.gmra.mrb[0].mxu1 %vm493_vm1, %v447_v27 }
  0xf1   : > { %v387_v37 = vadd.f32 %v889_v14, %v386_v36  ;;  %v434_v39 = vmax.f32 %v384_v32, 0.0 }
  0xf2   : > { %v437_v38 = vmax.f32 %v395_v35, 0.0 }
  0xf3   : > { %v435_v40 = vmax.f32 %v387_v37, 0.0 }
  0xf4   : > { %v449_v41 = vpack.c.bf16 %v437_v38, %v436_v34 }
  0xf5   : > { %v448_v42 = vpack.c.bf16 %v435_v40, %v434_v39  ;;  %v959_v43 = vpop.f32.mrb[8].mxu0 }
  0xf6   : > { %v408_v44 = vadd.f32 %v959_v43, %v889_v14  ;;  %v399_v45 = vpop.f32.mrb[9].mxu0 }
  0xf7   : > { %v400_v46 = vadd.f32 %v889_v14, %v399_v45  ;;  %v960_v47 = vpop.f32.mrb[10].mxu0  ;;  %977 = vmatprep.mubr.msk.bf16.mxu1 %vm493_vm1, %v448_v42 }
  0xf8   : > { %v440_v48 = vmax.f32 %v408_v44, 0.0  ;;  %v411_v49 = vadd.f32 %v960_v47, %v889_v14  ;;  %v402_v50 = vpop.f32.mrb[11].mxu0  ;;  %978 = vmatmul.mubr.msk.bf16.gmra.mrb[4].mxu1 %vm493_vm1, %v449_v41 }
  0xf9   : > { %v403_v51 = vadd.f32 %v889_v14, %v402_v50  ;;  %v438_v53 = vmax.f32 %v400_v46, 0.0 }
  0xfa   : > { %v441_v52 = vmax.f32 %v411_v49, 0.0 }
  0xfb   : > { %v439_v54 = vmax.f32 %v403_v51, 0.0 }
  0xfc   : > { %v451_v55 = vpack.c.bf16 %v441_v52, %v440_v48 }
  0xfd   : > { %v450_v56 = vpack.c.bf16 %v439_v54, %v438_v53  ;;  %v963_v57 = vpop.f32.mrb[12].mxu0 }
  0xfe   : > { %v424_v58 = vadd.f32 %v963_v57, %v889_v14  ;;  %v415_v59 = vpop.f32.mrb[13].mxu0 }
  0xff   : > { %v416_v60 = vadd.f32 %v889_v14, %v415_v59  ;;  %v964_v61 = vpop.f32.mrb[14].mxu0  ;;  %981 = vmatprep.mubr.msk.bf16.mxu1 %vm493_vm1, %v450_v56 }
 0x100   : > { %v444_v62 = vmax.f32 %v424_v58, 0.0  ;;  %v427_v63 = vadd.f32 %v964_v61, %v889_v14  ;;  %v418_v0 = vpop.f32.mrb[15].mxu0  ;;  %982 = vmatmul.mubr.msk.bf16.gmra.mrb[8].mxu1 %vm493_vm1, %v451_v55 }
 0x101   : > { %v419_v1 = vadd.f32 %v889_v14, %v418_v0  ;;  %v442_v3 = vmax.f32 %v416_v60, 0.0 }
 0x102   : > { %v445_v2 = vmax.f32 %v427_v63, 0.0 }
 0x103   : > { %v443_v4 = vmax.f32 %v419_v1, 0.0 }
 0x104   : > { %v453_v5 = vpack.c.bf16 %v445_v2, %v444_v62 }
 0x105   : > { %v452_v6 = vpack.c.bf16 %v443_v4, %v442_v3 }
 0x107   : > { %985 = vmatprep.mubr.msk.bf16.mxu1 %vm493_vm1, %v452_v6 }
 0x108   : > { %986 = vmatmul.mubr.msk.bf16.gmra.mrb[12].mxu1 %vm493_vm1, %v453_v5 }
 0x1c3   : > { %v975_v8 = vpop.f32.mrb[0].mxu1 }
 0x1c4   : > { %v1167_v9 = vadd.f32 %v975_v8, %v908_v7  ;;  %v552_v10 = vpop.f32.mrb[1].mxu1 }
 0x1c5   : > { %v1169_v11 = vadd.f32 %v908_v7, %v552_v10  ;;  %v976_v12 = vpop.f32.mrb[2].mxu1 }
 0x1c6   : > { %v1171_v13 = vadd.f32 %v976_v12, %v908_v7  ;;  %v555_v14 = vpop.f32.mrb[3].mxu1  ;;  %v622_v15 = vsel %vm615_vm2, %v1167_v9, -inf }
 0x1c7   : > { %v1175_v16 = vadd.f32 %v908_v7, %v555_v14  ;;  %623 = vmax.xlane.f32.xlu1 %v622_v15  ;;  %v616_v17 = vsel %vm615_vm2, %v1169_v11, -inf }
 0x1c8   : > { %617 = vmax.xlane.f32.xlu0 %v616_v17  ;;  %v625_v18 = vsel %vm615_vm2, %v1171_v13, -inf }
 0x1c9   : > { %v619_v20 = vsel %vm615_vm2, %v1175_v16, -inf }
 0x1cb   : > { %626 = vmax.xlane.f32.xlu1 %v625_v18  ;;  %v979_v19 = vpop.f32.mrb[4].mxu1 }
 0x1cc   : > { %v1183_v21 = vadd.f32 %v979_v19, %v908_v7  ;;  %v568_v22 = vpop.f32.mrb[5].mxu1  ;;  %620 = vmax.xlane.f32.xlu0 %v619_v20 }
 0x1cd   : > { %v980_v23 = vpop.f32.mrb[6].mxu1  ;;  %v1189_v27 = vadd.f32 %v908_v7, %v568_v22 }
 0x1ce   : > { %v1185_v24 = vadd.f32 %v980_v23, %v908_v7  ;;  %v571_v25 = vpop.f32.mrb[7].mxu1  ;;  %v634_v26 = vsel %vm615_vm2, %v1183_v21, -inf }
 0x1cf   : > { %v1191_v28 = vadd.f32 %v908_v7, %v571_v25  ;;  %v628_v31 = vsel %vm615_vm2, %v1189_v27, -inf }
 0x1d0   : > { %635 = vmax.xlane.f32.xlu0 %v634_v26  ;;  %v637_v29 = vsel %vm615_vm2, %v1185_v24, -inf }
 0x1d1   : > { %638 = vmax.xlane.f32.xlu1 %v637_v29  ;;  %v631_v34 = vsel %vm615_vm2, %v1191_v28, -inf }
 0x1d3   : > { %v983_v30 = vpop.f32.mrb[8].mxu1 }
 0x1d4   : > { %v1197_v32 = vadd.f32 %v983_v30, %v908_v7  ;;  %v584_v33 = vpop.f32.mrb[9].mxu1  ;;  %629 = vmax.xlane.f32.xlu0 %v628_v31 }
 0x1d5   : > { %v984_v35 = vpop.f32.mrb[10].mxu1  ;;  %632 = vmax.xlane.f32.xlu1 %v631_v34  ;;  %v1205_v39 = vadd.f32 %v908_v7, %v584_v33 }
 0x1d6   : > { %v1201_v36 = vadd.f32 %v984_v35, %v908_v7  ;;  %v587_v37 = vpop.f32.mrb[11].mxu1  ;;  %v646_v38 = vsel %vm615_vm2, %v1197_v32, -inf }
 0x1d7   : > { %v1207_v40 = vadd.f32 %v908_v7, %v587_v37  ;;  %v640_v43 = vsel %vm615_vm2, %v1205_v39, -inf }
 0x1d8   : > { %647 = vmax.xlane.f32.xlu0 %v646_v38  ;;  %v649_v41 = vsel %vm615_vm2, %v1201_v36, -inf }
 0x1d9   : > { %650 = vmax.xlane.f32.xlu1 %v649_v41  ;;  %v643_v45 = vsel %vm615_vm2, %v1207_v40, -inf }
 0x1db   : > { %v987_v42 = vpop.f32.mrb[12].mxu1 }
 0x1dc   : > { %v600_v44 = vpop.f32.mrb[13].mxu1  ;;  %641 = vmax.xlane.f32.xlu0 %v640_v43  ;;  %v1217_v49 = vadd.f32 %v987_v42, %v908_v7 }
 0x1dd   : > { %v1215_v46 = vadd.f32 %v908_v7, %v600_v44  ;;  %v988_v47 = vpop.f32.mrb[14].mxu1  ;;  %644 = vmax.xlane.f32.xlu1 %v643_v45 }
 0x1de   : > { %v603_v48 = vpop.f32.mrb[15].mxu1  ;;  %v1223_v52 = vadd.f32 %v988_v47, %v908_v7  ;;  %v658_v54 = vsel %vm615_vm2, %v1217_v49, -inf }
 0x1df   : > { %v1219_v50 = vadd.f32 %v908_v7, %v603_v48  ;;  %v652_v51 = vsel %vm615_vm2, %v1215_v46, -inf }
 0x1e0   : > { %653 = vmax.xlane.f32.xlu0 %v652_v51  ;;  %v661_v55 = vsel %vm615_vm2, %v1223_v52, -inf }
 0x1e1   : > { %v655_v53 = vsel %vm615_vm2, %v1219_v50, -inf }
 0x1e2   : > { %656 = vmax.xlane.f32.xlu1 %v655_v53 }
 0x1e4   : > { %659 = vmax.xlane.f32.xlu0 %v658_v54 }
 0x1e6   : > { %662 = vmax.xlane.f32.xlu1 %v661_v55 }
 0x254   : > { %v624_v56 = vpop.xlane.xlu1 %623 }
 0x255   : > { %v1232_v57 = vsub.f32 %v1167_v9, %v624_v56  ;;  %v618_v58 = vpop.xlane.xlu0 %617 }
 0x256   : > { %v1235_v59 = vsub.f32 %v1169_v11, %v618_v58 }
 0x257   : > { %v684_v60 = vmul.f32 1.442695, %v1232_v57 }
 0x258   : > { %v680_v61 = vmul.f32 1.442695, %v1235_v59  ;;  %v627_v62 = vpop.xlane.xlu1 %626 }
 0x259   : > { %1011 = vpow2.f32 %v684_v60  ;;  %v1240_v63 = vsub.f32 %v1171_v13, %v627_v62  ;;  %v621_v0 = vpop.xlane.xlu0 %620 }
 0x25a   : > { %v1243_v1 = vsub.f32 %v1175_v16, %v621_v0  ;;  %1013 = vpow2.f32 %v680_v61 }
 0x25b   : > { %v686_v2 = vmul.f32 1.442695, %v1240_v63 }
 0x25c   : > { %v682_v3 = vmul.f32 1.442695, %v1243_v1 }
 0x25d   : > { %1015 = vpow2.f32 %v686_v2  ;;  %v636_v4 = vpop.xlane.xlu0 %635 }
 0x25e   : > { %v1248_v5 = vsub.f32 %v1183_v21, %v636_v4  ;;  %v639_v6 = vpop.xlane.xlu1 %638  ;;  %1017 = vpow2.f32 %v682_v3 }
 0x25f   : > { %v1251_v7 = vsub.f32 %v1185_v24, %v639_v6 }
 0x260   : > { %v692_v8 = vmul.f32 1.442695, %v1248_v5 }
 0x261   : > { %v694_v9 = vmul.f32 1.442695, %v1251_v7  ;;  %v630_v10 = vpop.xlane.xlu0 %629 }
 0x262   : > { %1019 = vpow2.f32 %v692_v8  ;;  %v1256_v11 = vsub.f32 %v1189_v27, %v630_v10  ;;  %v633_v12 = vpop.xlane.xlu1 %632 }
 0x263   : > { %v1012_v13 = vpop.eup %1011  ;;  %1021 = vpow2.f32 %v694_v9  ;;  %v1259_v14 = vsub.f32 %v1191_v28, %v633_v12 }
 0x264   : > { %v688_v15 = vmul.f32 1.442695, %v1256_v11  ;;  %v718_v16 = vsel %vm615_vm2, %v1012_v13, 0.0  ;;  %v1014_v17 = vpop.eup %1013 }
 0x265   : > { %v690_v18 = vmul.f32 1.442695, %v1259_v14  ;;  %719 = vadd.xlane.f32.xlu0 %v718_v16  ;;  %v648_v19 = vpop.xlane.xlu0 %647  ;;  %v712_v26 = vsel %vm615_vm2, %v1014_v17, 0.0 }
 0x266   : > { %1023 = vpow2.f32 %v688_v15  ;;  %v1265_v20 = vsub.f32 %v1197_v32, %v648_v19  ;;  %v651_v21 = vpop.xlane.xlu1 %650 }
 0x267   : > { %v1016_v22 = vpop.eup %1015  ;;  %1025 = vpow2.f32 %v690_v18  ;;  %v1268_v23 = vsub.f32 %v1201_v36, %v651_v21 }
 0x268   : > { %v700_v24 = vmul.f32 1.442695, %v1265_v20  ;;  %v721_v25 = vsel %vm615_vm2, %v1016_v22, 0.0  ;;  %v1018_v27 = vpop.eup %1017 }
 0x269   : > { %v702_v28 = vmul.f32 1.442695, %v1268_v23  ;;  %722 = vadd.xlane.f32.xlu1 %v721_v25  ;;  %713 = vadd.xlane.f32.xlu0 %v712_v26  ;;  %v642_v29 = vpop.xlane.xlu0 %641  ;;  %v715_v35 = vsel %vm615_vm2, %v1018_v27, 0.0 }
 0x26a   : > { %1027 = vpow2.f32 %v700_v24  ;;  %v1275_v30 = vsub.f32 %v1205_v39, %v642_v29  ;;  %v645_v31 = vpop.xlane.xlu1 %644 }
 0x26b   : > { %1029 = vpow2.f32 %v702_v28  ;;  %v1278_v32 = vsub.f32 %v1207_v40, %v645_v31 }
 0x26c   : > { %v1020_v33 = vpop.eup %1019  ;;  %v696_v34 = vmul.f32 1.442695, %v1275_v30 }
 0x26d   : > { %v1022_v36 = vpop.eup %1021  ;;  %v698_v37 = vmul.f32 1.442695, %v1278_v32  ;;  %716 = vadd.xlane.f32.xlu1 %v715_v35  ;;  %v654_v38 = vpop.xlane.xlu0 %653  ;;  %v730_v41 = vsel %vm615_vm2, %v1020_v33, 0.0 }
 0x26e   : > { %1031 = vpow2.f32 %v696_v34  ;;  %v1285_v39 = vsub.f32 %v1215_v46, %v654_v38  ;;  %731 = vadd.xlane.f32.xlu0 %v730_v41  ;;  %v733_v45 = vsel %vm615_vm2, %v1022_v36, 0.0 }
 0x26f   : > { %1033 = vpow2.f32 %v698_v37  ;;  %v657_v40 = vpop.xlane.xlu1 %656 }
 0x270   : > { %v1024_v42 = vpop.eup %1023  ;;  %v704_v43 = vmul.f32 1.442695, %v1285_v39  ;;  %v1289_v44 = vsub.f32 %v1219_v50, %v657_v40 }
 0x271   : > { %v1026_v47 = vpop.eup %1025  ;;  %734 = vadd.xlane.f32.xlu1 %v733_v45  ;;  %v660_v48 = vpop.xlane.xlu0 %659  ;;  %v724_v51 = vsel %vm615_vm2, %v1024_v42, 0.0 }
 0x272   : > { %1035 = vpow2.f32 %v704_v43  ;;  %v706_v46 = vmul.f32 1.442695, %v1289_v44  ;;  %v1295_v53 = vsub.f32 %v1217_v49, %v660_v48  ;;  %725 = vadd.xlane.f32.xlu0 %v724_v51  ;;  %v727_v58 = vsel %vm615_vm2, %v1026_v47, 0.0 }
 0x273   : > { %v663_v54 = vpop.xlane.xlu1 %662 }
 0x274   : > { %v1028_v55 = vpop.eup %1027  ;;  %1037 = vpow2.f32 %v706_v46  ;;  %v708_v50 = vmul.f32 1.442695, %v1295_v53  ;;  %v1299_v56 = vsub.f32 %v1223_v52, %v663_v54 }
 0x275   : > { %v1030_v60 = vpop.eup %1029  ;;  %728 = vadd.xlane.f32.xlu1 %v727_v58  ;;  %v742_v61 = vsel %vm615_vm2, %v1028_v55, 0.0 }
 0x276   : > { %1039 = vpow2.f32 %v708_v50  ;;  %v710_v62 = vmul.f32 1.442695, %v1299_v56  ;;  %743 = vadd.xlane.f32.xlu0 %v742_v61  ;;  %v745_v0 = vsel %vm615_vm2, %v1030_v60, 0.0 }
 0x278   : > { %v1032_v49 = vpop.eup %1031  ;;  %1041 = vpow2.f32 %v710_v62 }
 0x279   : > { %v1034_v2 = vpop.eup %1033  ;;  %746 = vadd.xlane.f32.xlu1 %v745_v0  ;;  %v736_v3 = vsel %vm615_vm2, %v1032_v49, 0.0 }
 0x27a   : > { %737 = vadd.xlane.f32.xlu0 %v736_v3  ;;  %v739_v4 = vsel %vm615_vm2, %v1034_v2, 0.0 }
 0x27c   : > { %v1036_v52 = vpop.eup %1035 }
 0x27d   : > { %740 = vadd.xlane.f32.xlu1 %v739_v4  ;;  %v748_v6 = vsel %vm615_vm2, %v1036_v52, 0.0 }
 0x27e   : > { %v1038_v8 = vpop.eup %1037  ;;  %749 = vadd.xlane.f32.xlu0 %v748_v6 }
 0x27f   : > { %v751_v9 = vsel %vm615_vm2, %v1038_v8, 0.0 }
 0x280   : > { %v1040_v10 = vpop.eup %1039 }
 0x281   : > { %752 = vadd.xlane.f32.xlu1 %v751_v9  ;;  %v754_v12 = vsel %vm615_vm2, %v1040_v10, 0.0 }
 0x282   : > { %v1042_v13 = vpop.eup %1041  ;;  %755 = vadd.xlane.f32.xlu0 %v754_v12 }
 0x283   : > { %v757_v15 = vsel %vm615_vm2, %v1042_v13, 0.0 }
 0x285   : > { %758 = vadd.xlane.f32.xlu1 %v757_v15 }
 0x2f2   : > { %v720_v16 = vpop.xlane.xlu0 %719 }
 0x2f3   : > { %1043 = vlog2.f32 %v720_v16 }
 0x2f6   : > { %v723_v17 = vpop.xlane.xlu1 %722  ;;  %v714_v18 = vpop.xlane.xlu0 %713 }
 0x2f7   : > { %1045 = vlog2.f32 %v723_v17 }
 0x2f8   : > { %1047 = vlog2.f32 %v714_v18 }
 0x2fa   : > { %v717_v19 = vpop.xlane.xlu1 %716 }
 0x2fb   : > { %1049 = vlog2.f32 %v717_v19  ;;  %v732_v21 = vpop.xlane.xlu0 %731 }
 0x2fc   : > { %1051 = vlog2.f32 %v732_v21 }
 0x2fd   : > { %v1044_v22 = vpop.eup %1043 }
 0x2fe   : > { %v765_v24 = vmul.f32 0.6931472, %v1044_v22  ;;  %v735_v25 = vpop.xlane.xlu1 %734 }
 0x2ff   : > { %1053 = vlog2.f32 %v735_v25  ;;  %v726_v26 = vpop.xlane.xlu0 %725 }
 0x300   : > { %v794_v27 = vsub.f32 %v1232_v57, %v765_v24  ;;  %1055 = vlog2.f32 %v726_v26 }
 0x301   : > { %v1046_v28 = vpop.eup %1045 }
 0x302   : > { %v1048_v29 = vpop.eup %1047  ;;  %810 = vst.msk [vmem:[%s1315_s20 + $0x10] sm:$0xff] %vm615_vm2, %v794_v27  ;;  %v767_v31 = vmul.f32 0.6931472, %v1046_v28  ;;  %v729_v33 = vpop.xlane.xlu1 %728 }
 0x303   : > { %v761_v34 = vmul.f32 0.6931472, %v1048_v29  ;;  %1057 = vlog2.f32 %v729_v33  ;;  %v744_v35 = vpop.xlane.xlu0 %743 }
 0x304   : > { %v795_v36 = vsub.f32 %v1240_v63, %v767_v31  ;;  %1059 = vlog2.f32 %v744_v35 }
 0x305   : > { %v1050_v37 = vpop.eup %1049  ;;  %v792_v38 = vsub.f32 %v1235_v59, %v761_v34 }
 0x306   : > { %v1052_v41 = vpop.eup %1051  ;;  %811 = vst.msk [vmem:[%s1315_s20 + $0x18] sm:$0xff] %vm615_vm2, %v795_v36  ;;  %v763_v57 = vmul.f32 0.6931472, %v1050_v37  ;;  %v747_v40 = vpop.xlane.xlu1 %746 }
 0x307   : > { %808 = vst.msk [vmem:[%s1315_s20] sm:$0xff] %vm615_vm2, %v792_v38  ;;  %v773_v42 = vmul.f32 0.6931472, %v1052_v41  ;;  %1061 = vlog2.f32 %v747_v40  ;;  %v738_v43 = vpop.xlane.xlu0 %737 }
 0x308   : > { %v793_v45 = vsub.f32 %v1243_v1, %v763_v57  ;;  %1063 = vlog2.f32 %v738_v43 }
 0x309   : > { %v1054_v63 = vpop.eup %1053  ;;  %v798_v47 = vsub.f32 %v1248_v5, %v773_v42 }
 0x30a   : > { %v1056_v48 = vpop.eup %1055  ;;  %809 = vst.msk [vmem:[%s1315_s20 + $0x8] sm:$0xff] %vm615_vm2, %v793_v45  ;;  %v775_v59 = vmul.f32 0.6931472, %v1054_v63  ;;  %v741_v51 = vpop.xlane.xlu1 %740 }
 0x30b   : > { %814 = vst.msk [vmem:[%s1315_s20 + $0x30] sm:$0xff] %vm615_vm2, %v798_v47  ;;  %v769_v46 = vmul.f32 0.6931472, %v1056_v48  ;;  %1065 = vlog2.f32 %v741_v51  ;;  %v750_v54 = vpop.xlane.xlu0 %749 }
 0x30c   : > { %v799_v55 = vsub.f32 %v1251_v7, %v775_v59  ;;  %1067 = vlog2.f32 %v750_v54 }
 0x30d   : > { %v1058_v1 = vpop.eup %1057  ;;  %v796_v50 = vsub.f32 %v1256_v11, %v769_v46 }
 0x30e   : > { %v1060_v58 = vpop.eup %1059  ;;  %815 = vst.msk [vmem:[%s1315_s20 + $0x38] sm:$0xff] %vm615_vm2, %v799_v55  ;;  %v771_v5 = vmul.f32 0.6931472, %v1058_v1  ;;  %v753_v60 = vpop.xlane.xlu1 %752 }
 0x30f   : > { %812 = vst.msk [vmem:[%s1315_s20 + $0x20] sm:$0xff] %vm615_vm2, %v796_v50  ;;  %v781_v61 = vmul.f32 0.6931472, %v1060_v58  ;;  %1069 = vlog2.f32 %v753_v60  ;;  %v756_v62 = vpop.xlane.xlu0 %755 }
 0x310   : > { %v797_v49 = vsub.f32 %v1259_v14, %v771_v5  ;;  %1071 = vlog2.f32 %v756_v62 }
 0x311   : > { %v1062_v7 = vpop.eup %1061  ;;  %v802_v0 = vsub.f32 %v1265_v20, %v781_v61 }
 0x312   : > { %v1064_v11 = vpop.eup %1063  ;;  %813 = vst.msk [vmem:[%s1315_s20 + $0x28] sm:$0xff] %vm615_vm2, %v797_v49  ;;  %v783_v2 = vmul.f32 0.6931472, %v1062_v7  ;;  %v759_v3 = vpop.xlane.xlu1 %758 }
 0x313   : > { %818 = vst.msk [vmem:[%s1315_s20 + $0x50] sm:$0xff] %vm615_vm2, %v802_v0  ;;  %v777_v52 = vmul.f32 0.6931472, %v1064_v11  ;;  %1073 = vlog2.f32 %v759_v3 }
 0x314   : > { %v803_v4 = vsub.f32 %v1268_v23, %v783_v2 }
 0x315   : > { %v1066_v6 = vpop.eup %1065  ;;  %v800_v14 = vsub.f32 %v1275_v30, %v777_v52 }
 0x316   : > { %v1068_v8 = vpop.eup %1067  ;;  %819 = vst.msk [vmem:[%s1315_s20 + $0x58] sm:$0xff] %vm615_vm2, %v803_v4  ;;  %v779_v20 = vmul.f32 0.6931472, %v1066_v6 }
 0x317   : > { %816 = vst.msk [vmem:[%s1315_s20 + $0x40] sm:$0xff] %vm615_vm2, %v800_v14  ;;  %v785_v9 = vmul.f32 0.6931472, %v1068_v8 }
 0x318   : > { %v801_v10 = vsub.f32 %v1278_v32, %v779_v20 }
 0x319   : > { %v1070_v12 = vpop.eup %1069  ;;  %v804_v13 = vsub.f32 %v1285_v39, %v785_v9 }
 0x31a   : > { %v1072_v15 = vpop.eup %1071  ;;  %817 = vst.msk [vmem:[%s1315_s20 + $0x48] sm:$0xff] %vm615_vm2, %v801_v10  ;;  %v787_v23 = vmul.f32 0.6931472, %v1070_v12 }
 0x31b   : > { %820 = vst.msk [vmem:[%s1315_s20 + $0x60] sm:$0xff] %vm615_vm2, %v804_v13  ;;  %v789_v30 = vmul.f32 0.6931472, %v1072_v15 }
 0x31c   : > { %v805_v16 = vsub.f32 %v1289_v44, %v787_v23 }
 0x31d   : > { %v1074_v17 = vpop.eup %1073  ;;  %v806_v18 = vsub.f32 %v1295_v53, %v789_v30 }
 0x31e   : > { %821 = vst.msk [vmem:[%s1315_s20 + $0x68] sm:$0xff] %vm615_vm2, %v805_v16  ;;  %v791_v19 = vmul.f32 0.6931472, %v1074_v17 }
 0x31f   : > { %822 = vst.msk [vmem:[%s1315_s20 + $0x70] sm:$0xff] %vm615_vm2, %v806_v18 }
 0x320   : > { %v807_v32 = vsub.f32 %v1299_v56, %v791_v19 }
 0x322   : > { %823 = vst.msk [vmem:[%s1315_s20 + $0x78] sm:$0xff] %vm615_vm2, %v807_v32 }
 0x323 PF: > { %s15_s18 = sadd.s32 1, %s1081_s18  }
 0x324   : > { %p12_p4 = scmp.ge.s32.totalorder %s15_s18, 4  }
 0x326   :  { %14 = sbr.rel (!%p12_p4) target bundleno = 1 (0x1), region = 70 }

</bundles_post_ra>
